<compile_context>
chip_gen: v5e
topology: v5e:2x2
jax: 0.10.0
libtpu: 0.0.40
codegen_flags: <defaults>
</compile_context>

<pallas_src>
import jax
import jax.numpy as jnp
from jax.experimental import pallas as pl
from jax.experimental.pallas import tpu as pltpu


def _round_up(n, m):
    return (n + m - 1) // m * m


def mlp_man_kernel(w1_ref, b1_ref, w2_ref, b2_ref, x_ref, out_ref):
    """Feature-major block: x:(D0,TB), out:(D2,TB); weights/biases in SMEM."""
    d1, d0 = w1_ref.shape
    d2 = w2_ref.shape[0]

    # Each feature row is a fully lane-dense (TB,) f32 vector.
    x_rows = [x_ref[k, :] for k in range(d0)]

    # Layer 0: Linear(d0 -> d1) + ReLU, unrolled VPU broadcast-MACs (no MXU).
    h = []
    for j in range(d1):
        acc = x_rows[0] * w1_ref[j, 0] + b1_ref[j]
        for k in range(1, d0):
            acc = acc + x_rows[k] * w1_ref[j, k]
        h.append(jnp.maximum(acc, 0.0))

    # Layer 1: Linear(d1 -> d2) -> logit rows.
    logits = []
    for j in range(d2):
        acc = h[0] * w2_ref[j, 0] + b2_ref[j]
        for k in range(1, d1):
            acc = acc + h[k] * w2_ref[j, k]
        logits.append(acc)

    # LogSoftmax over the class axis (= row axis of the feature-major block),
    # numerically stable max-shifted form.
    m = logits[0]
    for j in range(1, d2):
        m = jnp.maximum(m, logits[j])
    ssum = jnp.exp(logits[0] - m)
    for j in range(1, d2):
        ssum = ssum + jnp.exp(logits[j] - m)
    lse = m + jnp.log(ssum)

    for j in range(d2):
        out_ref[j, :] = (logits[j] - lse).astype(out_ref.dtype)


def mlp_man_forward(x, w1, b1, w2, b2, *, block_b=1024):
    """x:(B,D0); w1:(D1,D0) torch layout; b1:(D1,); w2:(D2,D1); b2:(D2,)."""
    B, d0 = x.shape
    d1 = w1.shape[0]
    d2 = w2.shape[0]

    # Batch goes on the lane axis -> lane tile must be a multiple of 128.
    tb = min(block_b, _round_up(B, 128))
    bp = _round_up(B, tb)

    # Wrapper-side layout plumbing: transpose to feature-major and pad batch.
    x_t = jnp.pad(x.astype(jnp.float32).T, ((0, 0), (0, bp - B)))  # (D0, Bp)

    smem = pltpu.MemorySpace.SMEM
    out_t = pl.pallas_call(
        mlp_man_kernel,
        out_shape=jax.ShapeDtypeStruct((d2, bp), jnp.float32),
        grid=(bp // tb,),
        in_specs=[
            pl.BlockSpec((d1, d0), lambda i: (0, 0), memory_space=smem),  # w1
            pl.BlockSpec((d1,), lambda i: (0,), memory_space=smem),       # b1
            pl.BlockSpec((d2, d1), lambda i: (0, 0), memory_space=smem),  # w2
            pl.BlockSpec((d2,), lambda i: (0,), memory_space=smem),       # b2
            pl.BlockSpec((d0, tb), lambda i: (0, i)),                     # x (VMEM)
        ],
        out_specs=pl.BlockSpec((d2, tb), lambda i: (0, i)),
        compiler_params=pltpu.CompilerParams(
            dimension_semantics=("parallel",),
            vmem_limit_bytes=32 * 1024 * 1024,
        ),
    )(
        w1.astype(jnp.float32),
        b1.astype(jnp.float32),
        w2.astype(jnp.float32),
        b2.astype(jnp.float32),
        x_t,
    )
    # Back to (B, D2), dropping batch padding.
    return out_t[:, :B].T


def _torch_linear_init(key, out_f, in_f):
    """Deterministic PyTorch-style Linear init: U(-1/sqrt(in), 1/sqrt(in))."""
    kw, kb = jax.random.split(key)
    bound = 1.0 / jnp.sqrt(jnp.float32(in_f))
    w = jax.random.uniform(kw, (out_f, in_f), jnp.float32, -bound, bound)
    b = jax.random.uniform(kb, (out_f,), jnp.float32, -bound, bound)
    return w, b


def _reference(x, w1, b1, w2, b2):
    h = jnp.maximum(x @ w1.T + b1, 0.0)
    logits = h @ w2.T + b2
    return jax.nn.log_softmax(logits, axis=1)


if __name__ == "__main__":
    dims = [5, 3, 2]
    key = jax.random.PRNGKey(0)
    kx, k1, k2 = jax.random.split(key, 3)

    w1, b1 = _torch_linear_init(k1, dims[1], dims[0])
    w2, b2 = _torch_linear_init(k2, dims[2], dims[1])

    # Small canonical test (single grid step, batch padded to one lane tile).
    batch = 8
    x = jax.random.normal(kx, (batch, dims[0]), jnp.float32)
    out = jax.block_until_ready(mlp_man_forward(x, w1, b1, w2, b2))
    ref = _reference(x, w1, b1, w2, b2)
    assert out.shape == (batch, dims[2])
    assert jnp.allclose(out, ref, atol=1e-5, rtol=1e-5)

    # Exercise the batch grid (3 steps) and the padding path.
    batch2 = 300
    x2 = jax.random.normal(kx, (batch2, dims[0]), jnp.float32)
    out2 = jax.block_until_ready(mlp_man_forward(x2, w1, b1, w2, b2, block_b=128))
    ref2 = _reference(x2, w1, b1, w2, b2)
    assert out2.shape == (batch2, dims[2])
    assert jnp.allclose(out2, ref2, atol=1e-5, rtol=1e-5)

    print("KERNEL_OK")
</pallas_src>

<mosaic_0001>
module attributes {stable_mosaic.version = 11 : i64} {
  func.func @mlp_man_kernel(%arg0: i32, %arg1: memref<3x5xf32, #tpu.memory_space<smem>>, %arg2: memref<3xf32, #tpu.memory_space<smem>>, %arg3: memref<2x3xf32, #tpu.memory_space<smem>>, %arg4: memref<2xf32, #tpu.memory_space<smem>>, %arg5: memref<5x128xf32, #tpu.memory_space<vmem>>, %arg6: memref<2x128xf32, #tpu.memory_space<vmem>>) attributes {dimension_semantics = [#tpu.dimension_semantics<parallel>], iteration_bounds = array<i64: 1>, scalar_prefetch = 0 : i64, scratch_operands = 0 : i64, tpu.core_type = #tpu.core_type<tc>, window_params = [{transform_indices = @transform_0, window_bounds = array<i64: 3, 5>}, {transform_indices = @transform_1, window_bounds = array<i64: 3>}, {transform_indices = @transform_2, window_bounds = array<i64: 2, 3>}, {transform_indices = @transform_3, window_bounds = array<i64: 2>}, {transform_indices = @transform_4, window_bounds = array<i64: 5, 128>}, {transform_indices = @transform_5, window_bounds = array<i64: 2, 128>}]} {
    %c0 = arith.constant 0 : index
    %c0_0 = arith.constant 0 : index
    %0 = vector.load %arg5[%c0, %c0_0] : memref<5x128xf32, #tpu.memory_space<vmem>>, vector<1x128xf32>
    %1 = vector.shape_cast %0 : vector<1x128xf32> to vector<128xf32>
    %c1 = arith.constant 1 : index
    %c0_1 = arith.constant 0 : index
    %2 = vector.load %arg5[%c1, %c0_1] : memref<5x128xf32, #tpu.memory_space<vmem>>, vector<1x128xf32>
    %3 = vector.shape_cast %2 : vector<1x128xf32> to vector<128xf32>
    %c2 = arith.constant 2 : index
    %c0_2 = arith.constant 0 : index
    %4 = vector.load %arg5[%c2, %c0_2] : memref<5x128xf32, #tpu.memory_space<vmem>>, vector<1x128xf32>
    %5 = vector.shape_cast %4 : vector<1x128xf32> to vector<128xf32>
    %c3 = arith.constant 3 : index
    %c0_3 = arith.constant 0 : index
    %6 = vector.load %arg5[%c3, %c0_3] : memref<5x128xf32, #tpu.memory_space<vmem>>, vector<1x128xf32>
    %7 = vector.shape_cast %6 : vector<1x128xf32> to vector<128xf32>
    %c4 = arith.constant 4 : index
    %c0_4 = arith.constant 0 : index
    %8 = vector.load %arg5[%c4, %c0_4] : memref<5x128xf32, #tpu.memory_space<vmem>>, vector<1x128xf32>
    %9 = vector.shape_cast %8 : vector<1x128xf32> to vector<128xf32>
    %c0_5 = arith.constant 0 : index
    %c0_6 = arith.constant 0 : index
    %10 = memref.load %arg1[%c0_5, %c0_6] : memref<3x5xf32, #tpu.memory_space<smem>>
    %11 = vector.broadcast %10 : f32 to vector<128xf32>
    %12 = arith.mulf %1, %11 : vector<128xf32>
    %c0_7 = arith.constant 0 : index
    %13 = memref.load %arg2[%c0_7] : memref<3xf32, #tpu.memory_space<smem>>
    %14 = vector.broadcast %13 : f32 to vector<128xf32>
    %15 = arith.addf %12, %14 : vector<128xf32>
    %c0_8 = arith.constant 0 : index
    %c1_9 = arith.constant 1 : index
    %16 = memref.load %arg1[%c0_8, %c1_9] : memref<3x5xf32, #tpu.memory_space<smem>>
    %17 = vector.broadcast %16 : f32 to vector<128xf32>
    %18 = arith.mulf %3, %17 : vector<128xf32>
    %19 = arith.addf %15, %18 : vector<128xf32>
    %c0_10 = arith.constant 0 : index
    %c2_11 = arith.constant 2 : index
    %20 = memref.load %arg1[%c0_10, %c2_11] : memref<3x5xf32, #tpu.memory_space<smem>>
    %21 = vector.broadcast %20 : f32 to vector<128xf32>
    %22 = arith.mulf %5, %21 : vector<128xf32>
    %23 = arith.addf %19, %22 : vector<128xf32>
    %c0_12 = arith.constant 0 : index
    %c3_13 = arith.constant 3 : index
    %24 = memref.load %arg1[%c0_12, %c3_13] : memref<3x5xf32, #tpu.memory_space<smem>>
    %25 = vector.broadcast %24 : f32 to vector<128xf32>
    %26 = arith.mulf %7, %25 : vector<128xf32>
    %27 = arith.addf %23, %26 : vector<128xf32>
    %c0_14 = arith.constant 0 : index
    %c4_15 = arith.constant 4 : index
    %28 = memref.load %arg1[%c0_14, %c4_15] : memref<3x5xf32, #tpu.memory_space<smem>>
    %29 = vector.broadcast %28 : f32 to vector<128xf32>
    %30 = arith.mulf %9, %29 : vector<128xf32>
    %31 = arith.addf %27, %30 : vector<128xf32>
    %cst = arith.constant 0.000000e+00 : f32
    %32 = vector.broadcast %cst : f32 to vector<128xf32>
    %33 = arith.maximumf %31, %32 : vector<128xf32>
    %c1_16 = arith.constant 1 : index
    %c0_17 = arith.constant 0 : index
    %34 = memref.load %arg1[%c1_16, %c0_17] : memref<3x5xf32, #tpu.memory_space<smem>>
    %35 = vector.broadcast %34 : f32 to vector<128xf32>
    %36 = arith.mulf %1, %35 : vector<128xf32>
    %c1_18 = arith.constant 1 : index
    %37 = memref.load %arg2[%c1_18] : memref<3xf32, #tpu.memory_space<smem>>
    %38 = vector.broadcast %37 : f32 to vector<128xf32>
    %39 = arith.addf %36, %38 : vector<128xf32>
    %c1_19 = arith.constant 1 : index
    %c1_20 = arith.constant 1 : index
    %40 = memref.load %arg1[%c1_19, %c1_20] : memref<3x5xf32, #tpu.memory_space<smem>>
    %41 = vector.broadcast %40 : f32 to vector<128xf32>
    %42 = arith.mulf %3, %41 : vector<128xf32>
    %43 = arith.addf %39, %42 : vector<128xf32>
    %c1_21 = arith.constant 1 : index
    %c2_22 = arith.constant 2 : index
    %44 = memref.load %arg1[%c1_21, %c2_22] : memref<3x5xf32, #tpu.memory_space<smem>>
    %45 = vector.broadcast %44 : f32 to vector<128xf32>
    %46 = arith.mulf %5, %45 : vector<128xf32>
    %47 = arith.addf %43, %46 : vector<128xf32>
    %c1_23 = arith.constant 1 : index
    %c3_24 = arith.constant 3 : index
    %48 = memref.load %arg1[%c1_23, %c3_24] : memref<3x5xf32, #tpu.memory_space<smem>>
    %49 = vector.broadcast %48 : f32 to vector<128xf32>
    %50 = arith.mulf %7, %49 : vector<128xf32>
    %51 = arith.addf %47, %50 : vector<128xf32>
    %c1_25 = arith.constant 1 : index
    %c4_26 = arith.constant 4 : index
    %52 = memref.load %arg1[%c1_25, %c4_26] : memref<3x5xf32, #tpu.memory_space<smem>>
    %53 = vector.broadcast %52 : f32 to vector<128xf32>
    %54 = arith.mulf %9, %53 : vector<128xf32>
    %55 = arith.addf %51, %54 : vector<128xf32>
    %cst_27 = arith.constant 0.000000e+00 : f32
    %56 = vector.broadcast %cst_27 : f32 to vector<128xf32>
    %57 = arith.maximumf %55, %56 : vector<128xf32>
    %c2_28 = arith.constant 2 : index
    %c0_29 = arith.constant 0 : index
    %58 = memref.load %arg1[%c2_28, %c0_29] : memref<3x5xf32, #tpu.memory_space<smem>>
    %59 = vector.broadcast %58 : f32 to vector<128xf32>
    %60 = arith.mulf %1, %59 : vector<128xf32>
    %c2_30 = arith.constant 2 : index
    %61 = memref.load %arg2[%c2_30] : memref<3xf32, #tpu.memory_space<smem>>
    %62 = vector.broadcast %61 : f32 to vector<128xf32>
    %63 = arith.addf %60, %62 : vector<128xf32>
    %c2_31 = arith.constant 2 : index
    %c1_32 = arith.constant 1 : index
    %64 = memref.load %arg1[%c2_31, %c1_32] : memref<3x5xf32, #tpu.memory_space<smem>>
    %65 = vector.broadcast %64 : f32 to vector<128xf32>
    %66 = arith.mulf %3, %65 : vector<128xf32>
    %67 = arith.addf %63, %66 : vector<128xf32>
    %c2_33 = arith.constant 2 : index
    %c2_34 = arith.constant 2 : index
    %68 = memref.load %arg1[%c2_33, %c2_34] : memref<3x5xf32, #tpu.memory_space<smem>>
    %69 = vector.broadcast %68 : f32 to vector<128xf32>
    %70 = arith.mulf %5, %69 : vector<128xf32>
    %71 = arith.addf %67, %70 : vector<128xf32>
    %c2_35 = arith.constant 2 : index
    %c3_36 = arith.constant 3 : index
    %72 = memref.load %arg1[%c2_35, %c3_36] : memref<3x5xf32, #tpu.memory_space<smem>>
    %73 = vector.broadcast %72 : f32 to vector<128xf32>
    %74 = arith.mulf %7, %73 : vector<128xf32>
    %75 = arith.addf %71, %74 : vector<128xf32>
    %c2_37 = arith.constant 2 : index
    %c4_38 = arith.constant 4 : index
    %76 = memref.load %arg1[%c2_37, %c4_38] : memref<3x5xf32, #tpu.memory_space<smem>>
    %77 = vector.broadcast %76 : f32 to vector<128xf32>
    %78 = arith.mulf %9, %77 : vector<128xf32>
    %79 = arith.addf %75, %78 : vector<128xf32>
    %cst_39 = arith.constant 0.000000e+00 : f32
    %80 = vector.broadcast %cst_39 : f32 to vector<128xf32>
    %81 = arith.maximumf %79, %80 : vector<128xf32>
    %c0_40 = arith.constant 0 : index
    %c0_41 = arith.constant 0 : index
    %82 = memref.load %arg3[%c0_40, %c0_41] : memref<2x3xf32, #tpu.memory_space<smem>>
    %83 = vector.broadcast %82 : f32 to vector<128xf32>
    %84 = arith.mulf %33, %83 : vector<128xf32>
    %c0_42 = arith.constant 0 : index
    %85 = memref.load %arg4[%c0_42] : memref<2xf32, #tpu.memory_space<smem>>
    %86 = vector.broadcast %85 : f32 to vector<128xf32>
    %87 = arith.addf %84, %86 : vector<128xf32>
    %c0_43 = arith.constant 0 : index
    %c1_44 = arith.constant 1 : index
    %88 = memref.load %arg3[%c0_43, %c1_44] : memref<2x3xf32, #tpu.memory_space<smem>>
    %89 = vector.broadcast %88 : f32 to vector<128xf32>
    %90 = arith.mulf %57, %89 : vector<128xf32>
    %91 = arith.addf %87, %90 : vector<128xf32>
    %c0_45 = arith.constant 0 : index
    %c2_46 = arith.constant 2 : index
    %92 = memref.load %arg3[%c0_45, %c2_46] : memref<2x3xf32, #tpu.memory_space<smem>>
    %93 = vector.broadcast %92 : f32 to vector<128xf32>
    %94 = arith.mulf %81, %93 : vector<128xf32>
    %95 = arith.addf %91, %94 : vector<128xf32>
    %c1_47 = arith.constant 1 : index
    %c0_48 = arith.constant 0 : index
    %96 = memref.load %arg3[%c1_47, %c0_48] : memref<2x3xf32, #tpu.memory_space<smem>>
    %97 = vector.broadcast %96 : f32 to vector<128xf32>
    %98 = arith.mulf %33, %97 : vector<128xf32>
    %c1_49 = arith.constant 1 : index
    %99 = memref.load %arg4[%c1_49] : memref<2xf32, #tpu.memory_space<smem>>
    %100 = vector.broadcast %99 : f32 to vector<128xf32>
    %101 = arith.addf %98, %100 : vector<128xf32>
    %c1_50 = arith.constant 1 : index
    %c1_51 = arith.constant 1 : index
    %102 = memref.load %arg3[%c1_50, %c1_51] : memref<2x3xf32, #tpu.memory_space<smem>>
    %103 = vector.broadcast %102 : f32 to vector<128xf32>
    %104 = arith.mulf %57, %103 : vector<128xf32>
    %105 = arith.addf %101, %104 : vector<128xf32>
    %c1_52 = arith.constant 1 : index
    %c2_53 = arith.constant 2 : index
    %106 = memref.load %arg3[%c1_52, %c2_53] : memref<2x3xf32, #tpu.memory_space<smem>>
    %107 = vector.broadcast %106 : f32 to vector<128xf32>
    %108 = arith.mulf %81, %107 : vector<128xf32>
    %109 = arith.addf %105, %108 : vector<128xf32>
    %110 = arith.maximumf %95, %109 : vector<128xf32>
    %111 = arith.subf %95, %110 : vector<128xf32>
    %112 = math.exp %111 : vector<128xf32>
    %113 = arith.subf %109, %110 : vector<128xf32>
    %114 = math.exp %113 : vector<128xf32>
    %115 = arith.addf %112, %114 : vector<128xf32>
    %116 = math.log %115 : vector<128xf32>
    %117 = arith.addf %110, %116 : vector<128xf32>
    %118 = arith.subf %95, %117 : vector<128xf32>
    %c0_54 = arith.constant 0 : index
    %c0_55 = arith.constant 0 : index
    %119 = vector.load %arg6[%c0_54, %c0_55] : memref<2x128xf32, #tpu.memory_space<vmem>>, vector<1x128xf32>
    %120 = vector.shape_cast %119 : vector<1x128xf32> to vector<128xf32>
    %121 = vector.shape_cast %118 : vector<128xf32> to vector<1x128xf32>
    tpu.vector_store %arg6[%c0_54, %c0_55], %121 {strides = array<i32>} : memref<2x128xf32, #tpu.memory_space<vmem>>, vector<1x128xf32>,
    %122 = arith.subf %109, %117 : vector<128xf32>
    %c1_56 = arith.constant 1 : index
    %c0_57 = arith.constant 0 : index
    %123 = vector.load %arg6[%c1_56, %c0_57] : memref<2x128xf32, #tpu.memory_space<vmem>>, vector<1x128xf32>
    %124 = vector.shape_cast %123 : vector<1x128xf32> to vector<128xf32>
    %125 = vector.shape_cast %122 : vector<128xf32> to vector<1x128xf32>
    tpu.vector_store %arg6[%c1_56, %c0_57], %125 {strides = array<i32>} : memref<2x128xf32, #tpu.memory_space<vmem>>, vector<1x128xf32>,
    return
  }
  func.func @transform_0(%arg0: i32) -> (i32, i32) {
    %c0_i32 = arith.constant 0 : i32
    %c0_i32_0 = arith.constant 0 : i32
    %c0_i32_1 = arith.constant 0 : i32
    return %c0_i32, %c0_i32_0 : i32, i32
  }
  func.func @transform_1(%arg0: i32) -> i32 {
    %c0_i32 = arith.constant 0 : i32
    %c0_i32_0 = arith.constant 0 : i32
    return %c0_i32 : i32
  }
  func.func @transform_2(%arg0: i32) -> (i32, i32) {
    %c0_i32 = arith.constant 0 : i32
    %c0_i32_0 = arith.constant 0 : i32
    %c0_i32_1 = arith.constant 0 : i32
    return %c0_i32, %c0_i32_0 : i32, i32
  }
  func.func @transform_3(%arg0: i32) -> i32 {
    %c0_i32 = arith.constant 0 : i32
    %c0_i32_0 = arith.constant 0 : i32
    return %c0_i32 : i32
  }
  func.func @transform_4(%arg0: i32) -> (i32, i32) {
    %c0_i32 = arith.constant 0 : i32
    %c0_i32_0 = arith.constant 0 : i32
    return %c0_i32, %arg0 : i32, i32
  }
  func.func @transform_5(%arg0: i32) -> (i32, i32) {
    %c0_i32 = arith.constant 0 : i32
    %c0_i32_0 = arith.constant 0 : i32
    return %c0_i32, %arg0 : i32, i32
  }
}

</mosaic_0001>

<bundles_post_ra>
// kernel: tpu_custom_call.1
= control target key start
LH: loop header
LB: loop body
LE: loop exit
PB: predicated region body
PF: predicated region fallthrough
CT: control target
= control target key end

     0   :  { %10 = vsyncpa [#allocation5], 0  ;;  %s417_s0 = inlined_call_operand.hbm [shape: f32[3,5], index: 0, kind: input, shape index: {}]   ;;  %s418_s1 = inlined_call_operand.hbm [shape: f32[3], index: 1, kind: input, shape index: {}]   ;;  %s419_s2 = inlined_call_operand.hbm [shape: f32[2,3], index: 2, kind: input, shape index: {}]   ;;  %s420_s3 = inlined_call_operand.vmem [shape: f32[2], index: 3, kind: input, shape index: {}]   ;;  %s421_s4 = inlined_call_operand.hbm [shape: f32[5,128], index: 4, kind: input, shape index: {}]   ;;  %s422_s5 = inlined_call_operand.hbm [shape: f32[2,128], index: 5, kind: output, shape index: {}]  }
   0x1   :  { %11 = vsyncpa [#allocation8], 0 }
   0x2   :  { %12 = vsyncpa [#allocation6], 0 }
   0x3   :  { %13 = vsyncpa [#allocation3], 0  ;;  %s29_s20 = sshll.u32 %s418_s1, 4  ;;  %s30_s20 = int_to_ptr.hbm [resolvable:$true] %s29_s20 }
   0x4   :  { %14 = vsyncpa [#allocation4], 0  ;;  %s20_s23 = sshll.u32 %s417_s0, 4  ;;  %s360_s24 = smov [#allocation7]   ;;  %s21_s23 = int_to_ptr.hbm [resolvable:$true] %s20_s23 }
   0x5   :  { %32 = dma.hbm_to_smem %s30_s20, 16, %s360_s24, [#allocation8]  }
   0x6   :  { %s361_s25 = smov [#allocation2]   ;;  %s38_s28 = sshll.u32 %s419_s2, 4  ;;  %s39_s28 = int_to_ptr.hbm [resolvable:$true] %s38_s28 }
   0x7   :  { %23 = dma.hbm_to_smem %s21_s23, 64, %s361_s25, [#allocation5]  }
   0x8   :  { %s47_s1 = sshll.u32 %s420_s3, 4  ;;  %s362_s6 = smov [#allocation9]   ;;  %s48_s1 = int_to_ptr.vmem [resolvable:$true] %s47_s1 }
   0x9   :  { %41 = dma.hbm_to_smem %s39_s28, 32, %s362_s6, [#allocation8]  }
   0xa   :  { %s363_s7 = smov [#allocation10]   ;;  %s56_s9 = sshll.u32 %s421_s4, 4  ;;  %s57_s9 = int_to_ptr.hbm [resolvable:$true] %s56_s9 }
   0xb   :  { %50 = dma.vmem_to_smem %s48_s1, 16, %s363_s7, [#allocation6]  }
   0xc   :  { %s364_s10 = smov [#allocation11]  }
   0xd   :  { %s58_s11 = sshll.u32 %s364_s10, 4  ;;  %s59_s11 = int_to_ptr.vmem [resolvable:$true] %s58_s11 }
   0xe   :  { %61 = dma.hbm_to_vmem [thread:$0]  %s57_s9, 128, %s59_s11, [#allocation3]  }
   0xf   :  { %350 = dma.done.wait [#allocation5], 64  }
  0x10   :  { %351 = vsyncadd [#allocation5], 4294967232 }
  0x11   :  { %352 = dma.done.wait [#allocation8], 48  }
  0x12   :  { %353 = vsyncadd [#allocation8], 4294967248 }
  0x13   :  { %354 = dma.done.wait [#allocation6], 16  }
  0x14   :  { %355 = vsyncadd [#allocation6], 4294967280 }
  0x15   :  { %356 = dma.done.wait [#allocation3], 128  }
  0x16   :  { %357 = vsyncadd [#allocation3], 4294967168 }
  0x17   :  { %82 = sfence }
  0x18   :  { %s88_s2 = sld [smem:[#allocation2]]  ;;  %v83_v0 = vld [vmem:[#allocation11] sm:$0x1]  ;;  %v84_v1 = vld [vmem:[#allocation11 + $0x1] sm:$0x1]  ;;  %s365_s8 = smov [#allocation12]  }
  0x19   :  { %s91_s3 = sld [smem:[#allocation7]]  ;;  %v85_v3 = vld [vmem:[#allocation11 + $0x2] sm:$0x1]  ;;  %v86_v6 = vld [vmem:[#allocation11 + $0x3] sm:$0x1]  ;;  %s205_s9 = sshll.u32 %s365_s8, 4  ;;  %s206_s9 = int_to_ptr.vmem [resolvable:$true] %s205_s9 }
  0x1a   :  { %s220_s12 = sld [smem:[#allocation2 + $0x1]]  ;;  %v87_v11 = vld [vmem:[#allocation11 + $0x4] sm:$0x1] }
  0x1b   :  { %s221_s13 = sld [smem:[#allocation2 + $0x2]] }
  0x1c   :  { %s222_s4 = sld [smem:[#allocation2 + $0x3]] }
  0x1d   :  { %s223_s14 = sld [smem:[#allocation2 + $0x4]] }
  0x1e   :  { %v89_v2 = vstv %s88_s2  ;;  %s224_s15 = sld [smem:[#allocation2 + $0x80]]  ;;  %s207_s2 = sshll.u32 %s422_s5, 4  ;;  %s208_s2 = int_to_ptr.hbm [resolvable:$true] %s207_s2 }
  0x1f   :  { %v90_v4 = vmul.f32 %v89_v2, %v83_v0  ;;  %v92_v5 = vstv %s91_s3  ;;  %s225_s16 = sld [smem:[#allocation7 + $0x1]] }
  0x20   :  { %v95_v7 = vstv %s220_s12  ;;  %s226_s17 = sld [smem:[#allocation2 + $0x81]] }
  0x21   :  { %v93_v8 = vadd.f32 %v92_v5, %v90_v4  ;;  %v96_v9 = vmul.f32 %v95_v7, %v84_v1  ;;  %v99_v10 = vstv %s221_s13  ;;  %s227_s18 = sld [smem:[#allocation2 + $0x82]] }
  0x22   :  { %v100_v12 = vmul.f32 %v99_v10, %v85_v3  ;;  %v103_v13 = vstv %s222_s4  ;;  %s228_s19 = sld [smem:[#allocation2 + $0x83]] }
  0x23   :  { %v97_v14 = vadd.f32 %v96_v9, %v93_v8  ;;  %v104_v15 = vmul.f32 %v103_v13, %v86_v6  ;;  %v107_v16 = vstv %s223_s14  ;;  %s229_s20 = sld [smem:[#allocation2 + $0x84]] }
  0x24   :  { %v112_v17 = vstv %s224_s15  ;;  %s230_s21 = sld [smem:[#allocation2 + $0x100]]  ;;  %v108_v19 = vmul.f32 %v107_v16, %v87_v11 }
  0x25   :  { %v101_v18 = vadd.f32 %v100_v12, %v97_v14  ;;  %v113_v20 = vmul.f32 %v112_v17, %v83_v0  ;;  %v115_v21 = vstv %s225_s16  ;;  %s231_s22 = sld [smem:[#allocation7 + $0x2]] }
  0x26   :  { %v118_v22 = vstv %s226_s17  ;;  %s232_s23 = sld [smem:[#allocation2 + $0x101]] }
  0x27   :  { %v105_v23 = vadd.f32 %v104_v15, %v101_v18  ;;  %v116_v24 = vadd.f32 %v115_v21, %v113_v20  ;;  %v119_v25 = vmul.f32 %v118_v22, %v84_v1  ;;  %v122_v26 = vstv %s227_s18  ;;  %s233_s24 = sld [smem:[#allocation2 + $0x102]] }
  0x28   :  { %v123_v27 = vmul.f32 %v122_v26, %v85_v3  ;;  %v126_v28 = vstv %s228_s19  ;;  %s234_s25 = sld [smem:[#allocation2 + $0x103]] }
  0x29   :  { %v109_v29 = vadd.f32 %v108_v19, %v105_v23  ;;  %v120_v30 = vadd.f32 %v119_v25, %v116_v24  ;;  %v127_v31 = vmul.f32 %v126_v28, %v86_v6  ;;  %v130_v32 = vstv %s229_s20  ;;  %s235_s26 = sld [smem:[#allocation2 + $0x104]] }
  0x2a   :  { %v135_v33 = vstv %s230_s21  ;;  %s157_s27 = sld [smem:[#allocation9]]  ;;  %v131_v35 = vmul.f32 %v130_v32, %v87_v11 }
  0x2b   :  { %v124_v34 = vadd.f32 %v123_v27, %v120_v30  ;;  %v136_v36 = vmul.f32 %v135_v33, %v83_v0  ;;  %v138_v37 = vstv %s231_s22  ;;  %s160_s28 = sld [smem:[#allocation10]]  ;;  %v110_v38 = vmax.f32 %v109_v29, 0.0 }
  0x2c   :  { %v141_v39 = vstv %s232_s23  ;;  %s236_s29 = sld [smem:[#allocation9 + $0x1]] }
  0x2d   :  { %v128_v40 = vadd.f32 %v127_v31, %v124_v34  ;;  %v139_v41 = vadd.f32 %v138_v37, %v136_v36  ;;  %v142_v42 = vmul.f32 %v141_v39, %v84_v1  ;;  %v145_v43 = vstv %s233_s24  ;;  %s411_s30 = sld [smem:[#allocation9 + $0x2]] }
  0x2e   :  { %v146_v44 = vmul.f32 %v145_v43, %v85_v3  ;;  %v149_v45 = vstv %s234_s25  ;;  %s238_s1 = sld [smem:[#allocation9 + $0x80]] }
  0x2f   :  { %v132_v46 = vadd.f32 %v131_v35, %v128_v40  ;;  %v143_v47 = vadd.f32 %v142_v42, %v139_v41  ;;  %v150_v48 = vmul.f32 %v149_v45, %v86_v6  ;;  %v153_v49 = vstv %s235_s26  ;;  %s239_s6 = sld [smem:[#allocation10 + $0x1]] }
  0x30   :  { %v154_v50 = vmul.f32 %v153_v49, %v87_v11  ;;  %v158_v51 = vstv %s157_s27  ;;  %s240_s7 = sld [smem:[#allocation9 + $0x81]] }
  0x31   :  { %v133_v52 = vmax.f32 %v132_v46, 0.0  ;;  %v147_v53 = vadd.f32 %v146_v44, %v143_v47  ;;  %v159_v54 = vmul.f32 %v158_v51, %v110_v38  ;;  %v161_v55 = vstv %s160_s28  ;;  %s241_s0 = sld [smem:[#allocation9 + $0x82]] }
  0x32   :  { %v164_v56 = vstv %s236_s29 }
  0x33   :  { %v151_v57 = vadd.f32 %v150_v48, %v147_v53  ;;  %v162_v58 = vadd.f32 %v161_v55, %v159_v54  ;;  %v165_v59 = vmul.f32 %v164_v56, %v133_v52  ;;  %v168_v1 = vstv %s411_s30 }
  0x34   :  { %v172_v60 = vstv %s238_s1 }
  0x35   :  { %v155_v61 = vadd.f32 %v154_v50, %v151_v57  ;;  %v173_v62 = vmul.f32 %v172_v60, %v110_v38  ;;  %v175_v63 = vstv %s239_s6  ;;  %v166_v0 = vadd.f32 %v165_v59, %v162_v58 }
  0x36   :  { %v178_v2 = vstv %s240_s7 }
  0x37   :  { %v156_v3 = vmax.f32 %v155_v61, 0.0  ;;  %v176_v4 = vadd.f32 %v175_v63, %v173_v62  ;;  %v179_v5 = vmul.f32 %v178_v2, %v133_v52  ;;  %v182_v6 = vstv %s241_s0 }
  0x39   :  { %v169_v7 = vmul.f32 %v168_v1, %v156_v3  ;;  %v180_v8 = vadd.f32 %v179_v5, %v176_v4  ;;  %v183_v9 = vmul.f32 %v182_v6, %v156_v3 }
  0x3b   :  { %v170_v10 = vadd.f32 %v169_v7, %v166_v0  ;;  %v184_v11 = vadd.f32 %v183_v9, %v180_v8 }
  0x3d   :  { %v185_v12 = vmax.f32 %v170_v10, %v184_v11 }
  0x3f   :  { %v186_v13 = vsub.f32 %v170_v10, %v185_v12  ;;  %v189_v14 = vsub.f32 %v184_v11, %v185_v12 }
  0x41   :  { %v187_v15 = vmul.f32 1.442695, %v186_v13  ;;  %v190_v16 = vmul.f32 1.442695, %v189_v14 }
  0x43   :  { %248 = vpow2.f32 %v187_v15 }
  0x44   :  { %250 = vpow2.f32 %v190_v16 }
  0x49   :  { %v249_v17 = vpop.eup %248 }
  0x4a   :  { %v251_v18 = vpop.eup %250 }
  0x4b   :  { %v192_v19 = vadd.f32 %v251_v18, %v249_v17 }
  0x4d   :  { %252 = vlog2.f32 %v192_v19 }
  0x53   :  { %v253_v20 = vpop.eup %252 }
  0x54   :  { %v194_v21 = vmul.f32 0.6931472, %v253_v20 }
  0x56   :  { %v195_v22 = vadd.f32 %v194_v21, %v185_v12 }
  0x58   :  { %v196_v23 = vsub.f32 %v170_v10, %v195_v22  ;;  %v198_v24 = vsub.f32 %v184_v11, %v195_v22 }
  0x5a   :  { %197 = vst [vmem:[#allocation12] sm:$0x1] %v196_v23 }
  0x5b   :  { %199 = vst [vmem:[#allocation12 + $0x1] sm:$0x1] %v198_v24 }
  0x5c   :  { %210 = dma.vmem_to_hbm [thread:$0]  %s206_s9, 32, %s208_s2, [#allocation4]  }
  0x5d   :  { %358 = dma.done.wait [#allocation4], 32  }
  0x5e   :  { %359 = vsyncadd [#allocation4], 4294967264 }
  0x5f   :  { %215 = vsyncpa [#allocation3], 1 }
  0x60   :  { %216 = vsyncpa [#allocation4], 1 }
  0x61   :  { %217 = vsyncpa [#allocation5], 1 }
  0x62   :  { %218 = vsyncpa [#allocation8], 1 }
  0x63   :  { %219 = vsyncpa [#allocation6], 1 }

</bundles_post_ra>
